<compile_context>
chip_gen: v6e
topology: v6e:2x2x1
jax: 0.10.0
libtpu: 0.0.40
codegen_flags: <defaults>
</compile_context>

<pallas_src>
import jax
import jax.numpy as jnp
from jax.experimental import pallas as pl
from jax.experimental.pallas import tpu as pltpu


# Below this size the pallas copy is pure launch/pipeline overhead versus the
# zero-cost reshape, so we skip the kernel entirely.
_MIN_BYTES_FOR_KERNEL = 512 * 1024
# Keep one block <= 4 MiB so double-buffered input + output (4 x block) stays
# <= 16 MiB — safe under the tightest scoped-VMEM budget (v7x).
_MAX_BLOCK_BYTES = 4 * 1024 * 1024


def _flatten_copy_kernel(x_ref, o_ref):
    # Identity copy of the current (tile_n, tile_f) block: the entire hot path
    # of ToFeatureVector.forward (flatten == copy into an (N, C*H*W) buffer).
    o_ref[...] = x_ref[...]


def _choose_tiles(n, f, itemsize):
    """Pick sublane/lane tile sizes that are layout-legal and VMEM-safe."""
    # Sublane axis: full dim if tiny (block dim == array dim is legal),
    # otherwise a multiple of 8, capped so large batches don't blow up VMEM.
    tile_n = n if n <= 8 else min(512, (n // 8) * 8)
    # Lane axis: full dim if <= 128, otherwise a large multiple of 128.
    # 512+ lanes is where a mem-bound copy reaches ~85% of the HBM roofline.
    tile_f = f if f <= 128 else min(2048, (f // 128) * 128)
    # Shrink (lanes first, then sublanes) until one block fits the budget.
    while tile_n * tile_f * itemsize > _MAX_BLOCK_BYTES and tile_f > 128:
        tile_f = max(128, ((tile_f // 2) // 128) * 128)
    while tile_n * tile_f * itemsize > _MAX_BLOCK_BYTES and tile_n > 8:
        tile_n = max(8, ((tile_n // 2) // 8) * 8)
    return tile_n, tile_f


def _flatten_pallas(xf, donate_input=False):
    n, f = xf.shape
    tile_n, tile_f = _choose_tiles(n, f, xf.dtype.itemsize)
    grid = (pl.cdiv(n, tile_n), pl.cdiv(f, tile_f))  # partial edge blocks OK

    return pl.pallas_call(
        _flatten_copy_kernel,
        out_shape=jax.ShapeDtypeStruct((n, f), xf.dtype),
        grid_spec=pltpu.PrefetchScalarGridSpec(
            num_scalar_prefetch=0,
            grid=grid,
            in_specs=[pl.BlockSpec((tile_n, tile_f), lambda i, j: (i, j))],
            out_specs=pl.BlockSpec((tile_n, tile_f), lambda i, j: (i, j)),
        ),
        # P8: reuse the input HBM allocation for the output when the caller
        # can donate it (halves HBM footprint / traffic in that case).
        input_output_aliases={0: 0} if donate_input else {},
        compiler_params=pltpu.CompilerParams(
            # Both axes independent -> shard across 2 TCs on v7x.
            dimension_semantics=("parallel", "parallel"),
            vmem_limit_bytes=32 * 1024 * 1024,
        ),
    )(xf)


def to_feature_vector(x, force_kernel=False, donate_input=False):
    """Pallas implementation of ToFeatureVector.forward.

    `x` may be a single NCHW array or a tuple/list of arrays (multi-branch
    model output); tuple handling takes the last element, mirroring
    ToFeatureVector.tuple_to_tensor resolved at module construction time.
    """
    if isinstance(x, (tuple, list)):
        x = x[-1]

    n = x.shape[0]
    # Row-major flatten of all non-batch dims — identical ordering to
    # torch `x.view(x.size(0), -1)` on a contiguous NCHW tensor.  Pure glue.
    xf = jnp.reshape(x, (n, -1))

    total_bytes = xf.size * xf.dtype.itemsize
    if not force_kernel and total_bytes < _MIN_BYTES_FOR_KERNEL:
        # A flatten is metadata-only; below the gate the kernel would be 100%
        # launch/pipeline overhead, so return the free reshape.
        return xf
    return _flatten_pallas(xf, donate_input=donate_input)


if __name__ == "__main__":
    key = jax.random.PRNGKey(0)
    k1, k2, k3 = jax.random.split(key, 3)

    # Small NCHW input consistent with the module's conv-style inputs.
    x = jax.random.normal(k1, (2, 4, 16, 16), dtype=jnp.float32)
    ref = jnp.reshape(x, (2, -1))

    # Case 1: default path for small inputs -> zero-cost reshape (no kernel).
    y_small = jax.block_until_ready(to_feature_vector(x))
    assert y_small.shape == (2, 4 * 16 * 16)
    assert jnp.array_equal(y_small, ref)

    # Case 2: force the Pallas copy kernel on the same input.
    y_kern = jax.block_until_ready(to_feature_vector(x, force_kernel=True))
    assert y_kern.shape == (2, 4 * 16 * 16)
    assert jnp.array_equal(y_kern, ref)

    # Case 3: tuple input (multi-branch model output) -> take last element.
    x_other = jax.random.normal(k2, (2, 4, 16, 16), dtype=jnp.float32)
    y_tup = jax.block_until_ready(
        to_feature_vector((x_other, x), force_kernel=True))
    assert jnp.array_equal(y_tup, ref)

    # Case 4: feature dim larger than one lane tile -> multi-block grid with a
    # partial trailing block (exercises the remainder path).
    x_rem = jax.random.normal(k3, (16, 4, 24, 24), dtype=jnp.float32)  # F=2304
    y_rem = jax.block_until_ready(to_feature_vector(x_rem, force_kernel=True))
    assert y_rem.shape == (16, 4 * 24 * 24)
    assert jnp.array_equal(y_rem, jnp.reshape(x_rem, (16, -1)))

    print("KERNEL_OK")
</pallas_src>

<mosaic_0001>
module attributes {stable_mosaic.version = 11 : i64} {
  func.func @_flatten_copy_kernel(%arg0: i32, %arg1: i32, %arg2: memref<2x1024xf32, #tpu.memory_space<vmem>>, %arg3: memref<2x1024xf32, #tpu.memory_space<vmem>>) attributes {dimension_semantics = [#tpu.dimension_semantics<parallel>, #tpu.dimension_semantics<parallel>], iteration_bounds = array<i64: 1, 1>, scalar_prefetch = 0 : i64, scratch_operands = 0 : i64, tpu.core_type = #tpu.core_type<tc>, window_params = [{transform_indices = @transform_0, window_bounds = array<i64: 2, 1024>}, {transform_indices = @transform_1, window_bounds = array<i64: 2, 1024>}]} {
    %c0 = arith.constant 0 : index
    %c0_0 = arith.constant 0 : index
    %0 = vector.load %arg2[%c0, %c0_0] : memref<2x1024xf32, #tpu.memory_space<vmem>>, vector<2x1024xf32>
    %c0_1 = arith.constant 0 : index
    %c0_2 = arith.constant 0 : index
    %1 = vector.load %arg3[%c0_1, %c0_2] : memref<2x1024xf32, #tpu.memory_space<vmem>>, vector<2x1024xf32>
    tpu.vector_store %arg3[%c0_1, %c0_2], %0 {strides = array<i32>} : memref<2x1024xf32, #tpu.memory_space<vmem>>, vector<2x1024xf32>,
    return
  }
  func.func @transform_0(%arg0: i32, %arg1: i32) -> (i32, i32) {
    %c0_i32 = arith.constant 0 : i32
    return %arg0, %arg1 : i32, i32
  }
  func.func @transform_1(%arg0: i32, %arg1: i32) -> (i32, i32) {
    %c0_i32 = arith.constant 0 : i32
    return %arg0, %arg1 : i32, i32
  }
}

</mosaic_0001>

<bundles_post_ra>
// kernel: tpu_custom_call.1
= control target key start
LH: loop header
LB: loop body
LE: loop exit
PB: predicated region body
PF: predicated region fallthrough
CT: control target
= control target key end

     0   :  { %6 = vsyncpa [#allocation3], 0  ;;  %s104_s0 = inlined_call_operand.hbm [shape: f32[2,1024], index: 0, kind: input, shape index: {}]   ;;  %s105_s1 = inlined_call_operand.hbm [shape: f32[2,1024], index: 1, kind: output, shape index: {}]  }
   0x1   :  { %7 = vsyncpa [#allocation4], 0  ;;  %s86_s6 = smov [#allocation2]  }
   0x2   :  { %s14_s7 = sshll.u32 %s86_s6, 4  ;;  %s15_s7 = int_to_ptr.vmem [resolvable:$true] %s14_s7 }
   0x3   :  { %s50_s8 = scalar_lea.vmem %s15_s7, 256  ;;  %p55_p1 = scmp.lt.s32.totalorder %s15_s7, %s15_s7 }
   0x4   :  { %p51_p0 = scmp.ne.s32.totalorder %s15_s7, %s50_s8  ;;  %p56_p2 = scmp.lt.s32.totalorder %s50_s8, %s50_s8 }
   0x6   :  { %p57_p3 = por %p56_p2, %p55_p1 }
   0x8   :  { %p58_p4 = pnand %p57_p3, %p51_p0 }
   0xa   :  { %61 = shalt.err (!%p58_p4)
}
   0xb   :  { %17 = dma.hbm_to_vmem [thread:$0]  %s104_s0, 256, %s15_s7, [#allocation3]  }
   0xc   :  { %82 = dma.done.wait [#allocation3], 256  }
   0xd   :  { %83 = vsyncadd [#allocation3], 4294967040  ;;  %s87_s11 = smov [#allocation5]   ;;  %v21_v0 = vld [vmem:[#allocation2] sm:$0xff]  ;;  %v22_v1 = vld [vmem:[#allocation2 + $0x8] sm:$0xff] }
   0xe   :  { %s31_s12 = sshll.u32 %s87_s11, 4  ;;  %23 = vst [vmem:[#allocation5] sm:$0xff] %v21_v0  ;;  %24 = vst [vmem:[#allocation5 + $0x8] sm:$0xff] %v22_v1  ;;  %s32_s12 = int_to_ptr.vmem [resolvable:$true] %s31_s12 }
   0xf   :  { %s62_s13 = scalar_lea.vmem %s32_s12, 256  ;;  %p67_p6 = scmp.lt.s32.totalorder %s32_s12, %s32_s12 }
  0x10   :  { %p63_p5 = scmp.ne.s32.totalorder %s32_s12, %s62_s13  ;;  %p68_p7 = scmp.lt.s32.totalorder %s62_s13, %s62_s13 }
  0x12   :  { %p69_p8 = por %p68_p7, %p67_p6 }
  0x14   :  { %p70_p9 = pnand %p69_p8, %p63_p5 }
  0x16   :  { %73 = shalt.err (!%p70_p9)
}
  0x17   :  { %34 = dma.vmem_to_hbm [thread:$0]  %s32_s12, 256, %s105_s1, [#allocation4]  }
  0x18   :  { %84 = dma.done.wait [#allocation4], 256  }
  0x19   :  { %85 = vsyncadd [#allocation4], 4294967040 }
  0x1a   :  { %38 = vsyncpa [#allocation3], 1 }
  0x1b   :  { %39 = vsyncpa [#allocation4], 1 }

</bundles_post_ra>
